<compile_context>
chip_gen: v7x
topology: tpu7x:2x2x1
jax: 0.10.0
libtpu: 0.0.40
codegen_flags: <defaults>
</compile_context>

<pallas_src>
import jax
import jax.numpy as jnp
from jax.experimental import pallas as pl
from jax.experimental.pallas import tpu as pltpu


# ---------------------------------------------------------------------------
# Fused forward kernel: embedding + GCN stack + readout for ONE graph per step
# ---------------------------------------------------------------------------
def _make_fused_gcn_kernel(num_layers, residuals):
    """Build the fused kernel for a fixed layer count and residual flags."""

    def kernel(*refs):
        # refs = (a_ref, x_ref, w_embed, b_embed,
        #         w_0, b_0, ..., w_{L-1}, b_{L-1}, w_readout, o_ref)
        a_ref, x_ref, we_ref, be_ref = refs[0], refs[1], refs[2], refs[3]
        layer_refs = refs[4:4 + 2 * num_layers]
        wro_ref = refs[4 + 2 * num_layers]
        o_ref = refs[4 + 2 * num_layers + 1]

        a = a_ref[0]                      # [N, N]  bf16, graph_norm folded into rows
        x = x_ref[0]                      # [N, Dn] bf16

        # embedding_h : Linear(node_dim, in_dim)
        h = jnp.dot(x, we_ref[...], preferred_element_type=jnp.float32) + be_ref[...]

        # GCN stack -- h stays resident on-chip across all layers.
        for l in range(num_layers):
            w = layer_refs[2 * l][...]        # [Din, Dout] bf16, BN scale folded in
            b = layer_refs[2 * l + 1][0]      # [1, Dout]   f32, effective post-agg bias
            xw = jnp.dot(h.astype(jnp.bfloat16), w,
                         preferred_element_type=jnp.float32)        # h @ W'
            m = jnp.dot(a, xw.astype(jnp.bfloat16),
                        preferred_element_type=jnp.float32) + b     # A' @ (hW') + b'
            m = jnp.maximum(m, 0.0)                                  # ReLU (f32)
            if residuals[l]:
                m = m + h                                            # residual (f32)
            h = m

        # readout: mean over nodes as an MXU ones-matmul (1/N folded into wro),
        # then Linear(no bias) -> one lane-dense [1, out_dim] store.
        n_nodes = h.shape[0]
        ones_row = jnp.ones((1, n_nodes), jnp.bfloat16)
        hg = jnp.dot(ones_row, h.astype(jnp.bfloat16),
                     preferred_element_type=jnp.float32)             # [1, Dh]
        o_ref[0] = jnp.dot(hg.astype(jnp.bfloat16), wro_ref[...],
                           preferred_element_type=jnp.float32)       # [1, out_dim]

    return kernel


# ---------------------------------------------------------------------------
# GCNNet wrapper (parameters built deterministically in-script)
# ---------------------------------------------------------------------------
class GCNNetPallas:
    def __init__(self, key, node_dim, in_dim, hidden_dims, out_dim=128):
        self.node_dim = node_dim
        self.in_dim = in_dim
        self.hidden_dims = list(hidden_dims)
        self.out_dim = out_dim

        keys = jax.random.split(key, 2 + 2 * len(hidden_dims))
        k = iter(keys)

        # embedding_h : Linear(node_dim, in_dim)
        self.w_embed = 0.1 * jax.random.normal(next(k), (node_dim, in_dim), jnp.float32)
        self.b_embed = 0.1 * jax.random.normal(next(k), (1, in_dim), jnp.float32)

        # GCN layers
        self.layers = []
        d_in = in_dim
        eps = 1e-5
        for hd in hidden_dims:
            w = 0.1 * jax.random.normal(next(k), (d_in, hd), jnp.float32)
            b = 0.1 * jax.random.normal(next(k), (1, hd), jnp.float32)
            # BatchNorm1d eval-mode with default init: gamma=1, beta=0,
            # running_mean=0, running_var=1 -> scale = 1/sqrt(1+eps), shift = 0.
            gamma = jnp.ones((1, hd), jnp.float32)
            beta = jnp.zeros((1, hd), jnp.float32)
            run_mean = jnp.zeros((1, hd), jnp.float32)
            run_var = jnp.ones((1, hd), jnp.float32)
            bn_scale = gamma / jnp.sqrt(run_var + eps)
            bn_shift = beta - run_mean * bn_scale
            residual = (d_in == hd)   # residual disabled on dim change (DGL benchmark)
            self.layers.append((w, b, bn_scale, bn_shift, residual))
            d_in = hd

        # readout_mlp : Linear(hidden_dims[-1], out_dim, bias=False)
        self.w_readout = 0.1 * jax.random.normal(
            jax.random.fold_in(key, 777), (hidden_dims[-1], out_dim), jnp.float32)

    def __call__(self, a_hat, nodes_feat, edges_feat, nodes_num_norm_sqrt,
                 edges_num_norm_sqrt):
        # edges_feat / edges_num_norm_sqrt unused (matches the PyTorch forward).
        G, N, node_dim = nodes_feat.shape
        out_dim = self.out_dim
        num_layers = len(self.layers)
        residuals = tuple(layer[4] for layer in self.layers)

        # ------------------------------------------------------------------
        # Host-side algebraic folds (exact; plain-JAX glue outside the kernel)
        # ------------------------------------------------------------------
        # graph_norm: nodes_num_norm_sqrt is 1/sqrt(num_nodes), constant within
        # each graph, so it folds into the rows of A_hat once and into the
        # per-graph effective bias below.
        a_eff = (a_hat * nodes_num_norm_sqrt).astype(jnp.bfloat16)   # [G, N, N]
        snorm_g = nodes_num_norm_sqrt[:, :1, :]                      # [G, 1, 1]

        x = nodes_feat.astype(jnp.bfloat16)

        inputs = [a_eff, x, self.w_embed.astype(jnp.bfloat16), self.b_embed]
        in_specs = [
            pl.BlockSpec((1, N, N), lambda g: (g, 0, 0)),
            pl.BlockSpec((1, N, node_dim), lambda g: (g, 0, 0)),
            pl.BlockSpec((node_dim, self.in_dim), lambda g: (0, 0)),
            pl.BlockSpec((1, self.in_dim), lambda g: (0, 0)),
        ]

        for (w, b, bn_scale, bn_shift, residual) in self.layers:
            d_in, d_out = w.shape
            # BN scale is a column scaling -> commutes through left-mult by A,
            # so it folds into W. Bias is applied AFTER aggregation:
            #   b_eff = snorm * bn_scale * b + bn_shift   (per graph).
            w_eff = (w * bn_scale).astype(jnp.bfloat16)               # [Din, Dout]
            b_eff = snorm_g * (b * bn_scale)[None] + bn_shift[None]   # [G, 1, Dout] f32
            inputs.append(w_eff)
            inputs.append(b_eff)
            in_specs.append(pl.BlockSpec((d_in, d_out), lambda g: (0, 0)))
            in_specs.append(pl.BlockSpec((1, 1, d_out), lambda g: (g, 0, 0)))

        # mean_nodes' 1/N folds into the readout weight.
        w_ro_eff = (self.w_readout / float(N)).astype(jnp.bfloat16)
        inputs.append(w_ro_eff)
        in_specs.append(pl.BlockSpec(self.w_readout.shape, lambda g: (0, 0)))

        kernel = _make_fused_gcn_kernel(num_layers, residuals)

        logits = pl.pallas_call(
            kernel,
            out_shape=jax.ShapeDtypeStruct((G, 1, out_dim), jnp.float32),
            grid=(G,),
            in_specs=in_specs,
            out_specs=pl.BlockSpec((1, 1, out_dim), lambda g: (g, 0, 0)),
            compiler_params=pltpu.CompilerParams(
                dimension_semantics=("parallel",)),   # graphs split across TCs on v7x
        )(*inputs)

        return logits.reshape(G, out_dim)


# ---------------------------------------------------------------------------
# Pure-JAX f32 reference (same math, no folds) for a sanity check
# ---------------------------------------------------------------------------
def gcn_reference(model, a_hat, nodes_feat, nodes_num_norm_sqrt):
    h = nodes_feat @ model.w_embed + model.b_embed
    for (w, b, bn_scale, bn_shift, residual) in model.layers:
        h_in = h
        m = jnp.einsum("gij,gjd->gid", a_hat, h @ w) + b     # GraphConv (bias after agg)
        m = m * nodes_num_norm_sqrt                          # graph_norm
        m = m * bn_scale + bn_shift                          # eval-mode BN
        m = jnp.maximum(m, 0.0)                              # ReLU
        if residual:
            m = m + h_in
        h = m
    hg = jnp.mean(h, axis=1)
    return hg @ model.w_readout


def make_normalized_adjacency(key, G, N):
    """Random symmetric adjacency with self-loops, sym-normalized (plain JAX glue)."""
    a = (jax.random.uniform(key, (G, N, N)) < 0.3).astype(jnp.float32)
    a = jnp.maximum(a, jnp.transpose(a, (0, 2, 1)))          # symmetrize
    a = jnp.maximum(a, jnp.eye(N, dtype=jnp.float32)[None])  # self loops
    deg = jnp.sum(a, axis=-1, keepdims=True)                 # [G, N, 1]
    d_inv_sqrt = 1.0 / jnp.sqrt(deg)
    return a * d_inv_sqrt * jnp.transpose(d_inv_sqrt, (0, 2, 1))


if __name__ == "__main__":
    key = jax.random.PRNGKey(0)
    k_adj, k_feat, k_efeat, k_param = jax.random.split(key, 4)

    # Small shapes consistent with the module's forward.
    G, N = 2, 16           # 2 graphs, 16 nodes each
    node_dim = 8
    in_dim = 32
    hidden_dims = [32, 32]
    out_dim = 128
    E = 24                 # edges per graph (edge features unused by forward)

    a_hat = make_normalized_adjacency(k_adj, G, N)                       # [G, N, N]
    nodes_feat = jax.random.normal(k_feat, (G, N, node_dim), jnp.float32)
    edges_feat = jax.random.normal(k_efeat, (G, E, 4), jnp.float32)      # unused
    nodes_num_norm_sqrt = jnp.full((G, N, 1), 1.0 / jnp.sqrt(float(N)), jnp.float32)
    edges_num_norm_sqrt = jnp.full((G, E, 1), 1.0 / jnp.sqrt(float(E)), jnp.float32)  # unused

    model = GCNNetPallas(k_param, node_dim, in_dim, hidden_dims, out_dim)
    logits = model(a_hat, nodes_feat, edges_feat, nodes_num_norm_sqrt,
                   edges_num_norm_sqrt)
    jax.block_until_ready(logits)

    assert logits.shape == (G, out_dim), logits.shape
    assert logits.dtype == jnp.float32

    # Sanity check against the f32 reference (loose tol: bf16 matmul operands).
    ref = gcn_reference(model, a_hat, nodes_feat, nodes_num_norm_sqrt)
    err = float(jnp.max(jnp.abs(logits - ref)))
    scale = float(jnp.max(jnp.abs(ref))) + 1e-6
    assert err <= 1e-1 * scale + 5e-3, (err, scale)

    # TODO(synk): BatchNorm1d is implemented in eval mode (running stats); PyTorch's
    # default training-mode batch statistics are not reproduced here.
    print("KERNEL_OK")
</pallas_src>

<mosaic_0001>
module attributes {stable_mosaic.version = 11 : i64} {
  func.func @kernel(%arg0: i32, %arg1: memref<1x16x16xbf16, #tpu.memory_space<vmem>>, %arg2: memref<1x16x8xbf16, #tpu.memory_space<vmem>>, %arg3: memref<8x32xbf16, #tpu.memory_space<vmem>>, %arg4: memref<1x32xf32, #tpu.memory_space<vmem>>, %arg5: memref<32x32xbf16, #tpu.memory_space<vmem>>, %arg6: memref<1x1x32xf32, #tpu.memory_space<vmem>>, %arg7: memref<32x32xbf16, #tpu.memory_space<vmem>>, %arg8: memref<1x1x32xf32, #tpu.memory_space<vmem>>, %arg9: memref<32x128xbf16, #tpu.memory_space<vmem>>, %arg10: memref<1x1x128xf32, #tpu.memory_space<vmem>>) attributes {dimension_semantics = [#tpu.dimension_semantics<parallel>], iteration_bounds = array<i64: 2>, scalar_prefetch = 0 : i64, scratch_operands = 0 : i64, tpu.core_type = #tpu.core_type<tc>, window_params = [{transform_indices = @transform_0, window_bounds = array<i64: 1, 16, 16>}, {transform_indices = @transform_1, window_bounds = array<i64: 1, 16, 8>}, {pipeline_mode = #tpu.pipeline_mode<synchronous>, transform_indices = @transform_2, window_bounds = array<i64: 8, 32>}, {pipeline_mode = #tpu.pipeline_mode<synchronous>, transform_indices = @transform_3, window_bounds = array<i64: 1, 32>}, {pipeline_mode = #tpu.pipeline_mode<synchronous>, transform_indices = @transform_4, window_bounds = array<i64: 32, 32>}, {transform_indices = @transform_5, window_bounds = array<i64: 1, 1, 32>}, {pipeline_mode = #tpu.pipeline_mode<synchronous>, transform_indices = @transform_6, window_bounds = array<i64: 32, 32>}, {transform_indices = @transform_7, window_bounds = array<i64: 1, 1, 32>}, {pipeline_mode = #tpu.pipeline_mode<synchronous>, transform_indices = @transform_8, window_bounds = array<i64: 32, 128>}, {transform_indices = @transform_9, window_bounds = array<i64: 1, 1, 128>}]} {
    %c0 = arith.constant 0 : index
    %c0_0 = arith.constant 0 : index
    %c0_1 = arith.constant 0 : index
    %0 = vector.load %arg1[%c0, %c0_0, %c0_1] : memref<1x16x16xbf16, #tpu.memory_space<vmem>>, vector<1x16x16xbf16>
    %1 = vector.shape_cast %0 : vector<1x16x16xbf16> to vector<16x16xbf16>
    %c0_2 = arith.constant 0 : index
    %c0_3 = arith.constant 0 : index
    %c0_4 = arith.constant 0 : index
    %2 = vector.load %arg2[%c0_2, %c0_3, %c0_4] : memref<1x16x8xbf16, #tpu.memory_space<vmem>>, vector<1x16x8xbf16>
    %3 = vector.shape_cast %2 : vector<1x16x8xbf16> to vector<16x8xbf16>
    %c0_5 = arith.constant 0 : index
    %c0_6 = arith.constant 0 : index
    %4 = vector.load %arg3[%c0_5, %c0_6] : memref<8x32xbf16, #tpu.memory_space<vmem>>, vector<8x32xbf16>
    %cst = arith.constant dense<0.000000e+00> : vector<16x32xf32>
    %5 = tpu.matmul %3, %4, %cst {dimension_numbers = #tpu.dot_dimension_numbers<[1], [0], [0], [1], [0, 0, 1, 1], [], []>} : vector<16x8xbf16>, vector<8x32xbf16>, vector<16x32xf32> -> vector<16x32xf32>
    %c0_7 = arith.constant 0 : index
    %c0_8 = arith.constant 0 : index
    %6 = vector.load %arg4[%c0_7, %c0_8] : memref<1x32xf32, #tpu.memory_space<vmem>>, vector<1x32xf32>
    %7 = vector.broadcast %6 : vector<1x32xf32> to vector<16x32xf32>
    %8 = arith.addf %5, %7 : vector<16x32xf32>
    %c0_9 = arith.constant 0 : index
    %c0_10 = arith.constant 0 : index
    %9 = vector.load %arg5[%c0_9, %c0_10] : memref<32x32xbf16, #tpu.memory_space<vmem>>, vector<32x32xbf16>
    %c0_11 = arith.constant 0 : index
    %c0_12 = arith.constant 0 : index
    %c0_13 = arith.constant 0 : index
    %10 = vector.load %arg6[%c0_11, %c0_12, %c0_13] : memref<1x1x32xf32, #tpu.memory_space<vmem>>, vector<1x1x32xf32>
    %11 = vector.shape_cast %10 : vector<1x1x32xf32> to vector<1x32xf32>
    %12 = arith.truncf %8 : vector<16x32xf32> to vector<16x32xbf16>
    %cst_14 = arith.constant dense<0.000000e+00> : vector<16x32xf32>
    %13 = tpu.matmul %12, %9, %cst_14 {dimension_numbers = #tpu.dot_dimension_numbers<[1], [0], [0], [1], [0, 0, 1, 1], [], []>} : vector<16x32xbf16>, vector<32x32xbf16>, vector<16x32xf32> -> vector<16x32xf32>
    %14 = arith.truncf %13 : vector<16x32xf32> to vector<16x32xbf16>
    %cst_15 = arith.constant dense<0.000000e+00> : vector<16x32xf32>
    %15 = tpu.matmul %1, %14, %cst_15 {dimension_numbers = #tpu.dot_dimension_numbers<[1], [0], [0], [1], [0, 0, 1, 1], [], []>} : vector<16x16xbf16>, vector<16x32xbf16>, vector<16x32xf32> -> vector<16x32xf32>
    %16 = vector.broadcast %11 : vector<1x32xf32> to vector<16x32xf32>
    %17 = arith.addf %15, %16 : vector<16x32xf32>
    %cst_16 = arith.constant 0.000000e+00 : f32
    %18 = vector.broadcast %cst_16 : f32 to vector<16x32xf32>
    %19 = arith.maximumf %17, %18 : vector<16x32xf32>
    %20 = arith.addf %19, %8 : vector<16x32xf32>
    %c0_17 = arith.constant 0 : index
    %c0_18 = arith.constant 0 : index
    %21 = vector.load %arg7[%c0_17, %c0_18] : memref<32x32xbf16, #tpu.memory_space<vmem>>, vector<32x32xbf16>
    %c0_19 = arith.constant 0 : index
    %c0_20 = arith.constant 0 : index
    %c0_21 = arith.constant 0 : index
    %22 = vector.load %arg8[%c0_19, %c0_20, %c0_21] : memref<1x1x32xf32, #tpu.memory_space<vmem>>, vector<1x1x32xf32>
    %23 = vector.shape_cast %22 : vector<1x1x32xf32> to vector<1x32xf32>
    %24 = arith.truncf %20 : vector<16x32xf32> to vector<16x32xbf16>
    %cst_22 = arith.constant dense<0.000000e+00> : vector<16x32xf32>
    %25 = tpu.matmul %24, %21, %cst_22 {dimension_numbers = #tpu.dot_dimension_numbers<[1], [0], [0], [1], [0, 0, 1, 1], [], []>} : vector<16x32xbf16>, vector<32x32xbf16>, vector<16x32xf32> -> vector<16x32xf32>
    %26 = arith.truncf %25 : vector<16x32xf32> to vector<16x32xbf16>
    %cst_23 = arith.constant dense<0.000000e+00> : vector<16x32xf32>
    %27 = tpu.matmul %1, %26, %cst_23 {dimension_numbers = #tpu.dot_dimension_numbers<[1], [0], [0], [1], [0, 0, 1, 1], [], []>} : vector<16x16xbf16>, vector<16x32xbf16>, vector<16x32xf32> -> vector<16x32xf32>
    %28 = vector.broadcast %23 : vector<1x32xf32> to vector<16x32xf32>
    %29 = arith.addf %27, %28 : vector<16x32xf32>
    %cst_24 = arith.constant 0.000000e+00 : f32
    %30 = vector.broadcast %cst_24 : f32 to vector<16x32xf32>
    %31 = arith.maximumf %29, %30 : vector<16x32xf32>
    %32 = arith.addf %31, %20 : vector<16x32xf32>
    %cst_25 = arith.constant 1.000000e+00 : bf16
    %33 = vector.broadcast %cst_25 : bf16 to vector<1x16xbf16>
    %34 = arith.truncf %32 : vector<16x32xf32> to vector<16x32xbf16>
    %cst_26 = arith.constant dense<0.000000e+00> : vector<1x32xf32>
    %35 = tpu.matmul %33, %34, %cst_26 {dimension_numbers = #tpu.dot_dimension_numbers<[1], [0], [0], [1], [0, 0, 1, 1], [], []>} : vector<1x16xbf16>, vector<16x32xbf16>, vector<1x32xf32> -> vector<1x32xf32>
    %36 = arith.truncf %35 : vector<1x32xf32> to vector<1x32xbf16>
    %c0_27 = arith.constant 0 : index
    %c0_28 = arith.constant 0 : index
    %37 = vector.load %arg9[%c0_27, %c0_28] : memref<32x128xbf16, #tpu.memory_space<vmem>>, vector<32x128xbf16>
    %cst_29 = arith.constant dense<0.000000e+00> : vector<1x128xf32>
    %38 = tpu.matmul %36, %37, %cst_29 {dimension_numbers = #tpu.dot_dimension_numbers<[1], [0], [0], [1], [0, 0, 1, 1], [], []>} : vector<1x32xbf16>, vector<32x128xbf16>, vector<1x128xf32> -> vector<1x128xf32>
    %c0_30 = arith.constant 0 : index
    %c0_31 = arith.constant 0 : index
    %c0_32 = arith.constant 0 : index
    %39 = vector.load %arg10[%c0_30, %c0_31, %c0_32] : memref<1x1x128xf32, #tpu.memory_space<vmem>>, vector<1x1x128xf32>
    %40 = vector.shape_cast %39 : vector<1x1x128xf32> to vector<1x128xf32>
    %41 = vector.shape_cast %38 : vector<1x128xf32> to vector<1x1x128xf32>
    tpu.vector_store %arg10[%c0_30, %c0_31, %c0_32], %41 {strides = array<i32>} : memref<1x1x128xf32, #tpu.memory_space<vmem>>, vector<1x1x128xf32>,
    return
  }
  func.func @transform_0(%arg0: i32) -> (i32, i32, i32) {
    %c0_i32 = arith.constant 0 : i32
    %c0_i32_0 = arith.constant 0 : i32
    %c0_i32_1 = arith.constant 0 : i32
    return %arg0, %c0_i32, %c0_i32_0 : i32, i32, i32
  }
  func.func @transform_1(%arg0: i32) -> (i32, i32, i32) {
    %c0_i32 = arith.constant 0 : i32
    %c0_i32_0 = arith.constant 0 : i32
    %c0_i32_1 = arith.constant 0 : i32
    return %arg0, %c0_i32, %c0_i32_0 : i32, i32, i32
  }
  func.func @transform_2(%arg0: i32) -> (i32, i32) {
    %c0_i32 = arith.constant 0 : i32
    %c0_i32_0 = arith.constant 0 : i32
    %c0_i32_1 = arith.constant 0 : i32
    return %c0_i32, %c0_i32_0 : i32, i32
  }
  func.func @transform_3(%arg0: i32) -> (i32, i32) {
    %c0_i32 = arith.constant 0 : i32
    %c0_i32_0 = arith.constant 0 : i32
    %c0_i32_1 = arith.constant 0 : i32
    return %c0_i32, %c0_i32_0 : i32, i32
  }
  func.func @transform_4(%arg0: i32) -> (i32, i32) {
    %c0_i32 = arith.constant 0 : i32
    %c0_i32_0 = arith.constant 0 : i32
    %c0_i32_1 = arith.constant 0 : i32
    return %c0_i32, %c0_i32_0 : i32, i32
  }
  func.func @transform_5(%arg0: i32) -> (i32, i32, i32) {
    %c0_i32 = arith.constant 0 : i32
    %c0_i32_0 = arith.constant 0 : i32
    %c0_i32_1 = arith.constant 0 : i32
    return %arg0, %c0_i32, %c0_i32_0 : i32, i32, i32
  }
  func.func @transform_6(%arg0: i32) -> (i32, i32) {
    %c0_i32 = arith.constant 0 : i32
    %c0_i32_0 = arith.constant 0 : i32
    %c0_i32_1 = arith.constant 0 : i32
    return %c0_i32, %c0_i32_0 : i32, i32
  }
  func.func @transform_7(%arg0: i32) -> (i32, i32, i32) {
    %c0_i32 = arith.constant 0 : i32
    %c0_i32_0 = arith.constant 0 : i32
    %c0_i32_1 = arith.constant 0 : i32
    return %arg0, %c0_i32, %c0_i32_0 : i32, i32, i32
  }
  func.func @transform_8(%arg0: i32) -> (i32, i32) {
    %c0_i32 = arith.constant 0 : i32
    %c0_i32_0 = arith.constant 0 : i32
    %c0_i32_1 = arith.constant 0 : i32
    return %c0_i32, %c0_i32_0 : i32, i32
  }
  func.func @transform_9(%arg0: i32) -> (i32, i32, i32) {
    %c0_i32 = arith.constant 0 : i32
    %c0_i32_0 = arith.constant 0 : i32
    %c0_i32_1 = arith.constant 0 : i32
    return %arg0, %c0_i32, %c0_i32_0 : i32, i32, i32
  }
}

</mosaic_0001>

<bundles_post_ra>
// kernel: tpu_custom_call.1
= control target key start
LH: loop header
LB: loop body
LE: loop exit
PB: predicated region body
PF: predicated region fallthrough
CT: control target
= control target key end

     0   :  { %14 = vsyncpa [#allocation3], 0  ;;  %s1746_s0 = inlined_call_operand.vmem [shape: bf16[2,16,16], index: 0, kind: input, shape index: {}]   ;;  %s1747_s1 = inlined_call_operand.vmem [shape: bf16[2,16,8], index: 1, kind: input, shape index: {}]   ;;  %s1748_s2 = inlined_call_operand.hbm [shape: bf16[8,32], index: 2, kind: input, shape index: {}]   ;;  %s1749_s3 = inlined_call_operand.hbm [shape: f32[1,32], index: 3, kind: input, shape index: {}]   ;;  %s1750_s4 = inlined_call_operand.vmem [shape: bf16[32,32], index: 4, kind: input, shape index: {}]   ;;  %s1751_s5 = inlined_call_operand.vmem [shape: f32[2,1,32], index: 5, kind: input, shape index: {}]   ;;  %s1752_s6 = inlined_call_operand.hbm [shape: bf16[32,32], index: 6, kind: input, shape index: {}]   ;;  %s1753_s7 = inlined_call_operand.hbm [shape: f32[2,1,32], index: 7, kind: input, shape index: {}]   ;;  %s1754_s8 = inlined_call_operand.vmem [shape: bf16[32,128], index: 8, kind: input, shape index: {}]   ;;  %s1755_s9 = inlined_call_operand.hbm [shape: f32[2,1,128], index: 9, kind: output, shape index: {}]  }
   0x1   :  { %15 = vsyncpa [#allocation6], 0 }
   0x2   :  { %16 = vsyncpa [#allocation9], 0 }
   0x3   :  { %18 = vsyncpa [#allocation9 + $0x1], 0 }
   0x4   :  { %19 = vsyncpa [#allocation4], 0 }
   0x5   :  { %21 = vsyncpa [#allocation4 + $0x1], 0  ;;  %s1432_s30 = smov 0   ;;  %s1434_s10 = smov 0  }
   0x6   :  { %s1436_s11 = smov 0   ;;  %s1438_s12 = smov 0  }
   0x7 LB: > { %s1453_s13 = sadd.s32 4294967295, %s1370_s12   ;;  %s989_s14 = sadd.s32 4294967294, %s1370_s12   ;;  %s1370_s12 = sphi %s1438_s12, %s1781_s12   ;;  %s1366_s11 = sphi %s1436_s11, %s1780_s11   ;;  %s1362_s10 = sphi %s1434_s10, %s1779_s10   ;;  %s1358_s30 = sphi %s1432_s30, %s1778_s30  }
   0x8   : > { %p209_p0 = scmp.ne.s32.totalorder %s1362_s10, %s1358_s30  ;;  %p1756_p1 = scmp.eq.s32.totalorder %s1453_s13, 0 }
   0x9   : > { %p260_p3 = scmp.eq.s32.totalorder %s989_s14, 1  ;;  %p990_p5 = scmp.ge.s32.totalorder %s1370_s12, 1 }
   0xa   : > { %p1462_p4 = por %p1756_p1, %p209_p0  ;;  %p267_p7 = scmp.lt.s32.totalorder %s1370_s12, 3 }
   0xb   : > { %p1467_p6 = por %p260_p3, %p209_p0  ;;  %s1372_s18 = smov [#allocation5]  }
   0xc   : > { %s1760_s15 = scalar_select %p1462_p4, 1, 0 }
   0xd   : > { %s1761_s16 = scalar_select %p1467_p6, 1, 0 }
   0xe   : > { %p1472_p8 = pnand %p990_p5, %p267_p7  ;;  %s291_s19 = sshll.u32 %s1372_s18, 4  ;;  %s292_s19 = int_to_ptr.vmem [resolvable:$true] %s291_s19 }
   0xf   : > { %1762 = sst [smem:[#allocation15_spill]] %s1761_s16  ;;  %s1373_s20 = smov [#allocation2]  }
  0x10   : > { %s1763_s17 = scalar_select %p1472_p8, 1, 0 }
  0x11   : > { %p1108_p10 = pneg %p1472_p8  ;;  %s280_s21 = sshll.u32 %s1373_s20, 4  ;;  %s1485_s21 = int_to_ptr.vmem [resolvable:$true] %s280_s21 }
  0x12   : > { %s1374_s23 = smov [#allocation7]   ;;  %s1182_s27 = scalar_lea.hbm %s1749_s3, 16 }
  0x13   : > { %p1481_p11 = pnand %p1108_p10, %p1756_p1  ;;  %s304_s24 = sshll.u32 %s1374_s23, 4  ;;  %s1487_s24 = int_to_ptr.vmem [resolvable:$true] %s304_s24 }
  0x14   : > { %p1183_p12 = scmp.ne.s32.totalorder %s1749_s3, %s1182_s27  ;;  %p1189_p5 = scmp.lt.u32.totalorder %s1182_s27, %s1749_s3 }
  0x15   : > { %p1497_p13 = pneg %p1481_p11 }
  0x17   : > { %p1185_p0 = pnand %p1497_p13, %p1183_p12 }
  0x19   : > { %p1186_p3 = pneg %p1185_p0 }
  0x1b   : > { %p1191_p7 = pnand %p1189_p5, %p1186_p3 }
  0x1d   : > { %1194 = shalt.err (!%p1191_p7)
}
  0x1e   : > { %s1195_s23 = scalar_lea.vmem %s292_s19, 16  ;;  %s1202_s25 = scalar_lea.vmem %s292_s19, 32 }
  0x1f   : > { %p1196_p10 = scmp.ne.s32.totalorder %s292_s19, %s1195_s23  ;;  %p1203_p2 = scmp.lt.s32.totalorder %s292_s19, %s292_s19 }
  0x20   : > { %p1204_p6 = scmp.lt.s32.totalorder %s1202_s25, %s1195_s23 }
  0x21   : > { %p1198_p9 = pnand %p1196_p10, %p1497_p13 }
  0x22   : > { %p1205_p4 = por %p1204_p6, %p1203_p2 }
  0x23   : > { %p1199_p1 = pneg %p1198_p9 }
  0x25   : > { %p1206_p8 = pnand %p1205_p4, %p1199_p1 }
  0x27   : > { %1209 = shalt.err (!%p1206_p8)
}
  0x28   : > { %1114 = dma.hbm_to_vmem [thread:$0]  (!%p1481_p11), %s1749_s3, 16, %s292_s19, [#allocation6]  }
  0x29   : > { %s1210_s18 = scalar_lea.hbm %s1748_s2, 64 }
  0x2a   : > { %p1211_p9 = scmp.ne.s32.totalorder %s1748_s2, %s1210_s18  ;;  %p1217_p1 = scmp.lt.u32.totalorder %s1210_s18, %s1748_s2 }
  0x2c   : > { %p1213_p12 = pnand %p1211_p9, %p1497_p13 }
  0x2e   : > { %p1214_p2 = pneg %p1213_p12 }
  0x30   : > { %p1219_p4 = pnand %p1217_p1, %p1214_p2 }
  0x32   : > { %1222 = shalt.err (!%p1219_p4)
}
  0x33   : > { %s1223_s19 = scalar_lea.vmem %s1485_s21, 64  ;;  %p1231_p3 = scmp.lt.s32.totalorder %s1485_s21, %s1485_s21 }
  0x34   : > { %p1224_p6 = scmp.ne.s32.totalorder %s1485_s21, %s1223_s19  ;;  %p1232_p5 = scmp.lt.s32.totalorder %s1223_s19, %s1223_s19 }
  0x36   : > { %p1226_p8 = pnand %p1224_p6, %p1497_p13  ;;  %p1233_p7 = por %p1232_p5, %p1231_p3 }
  0x38   : > { %p1227_p0 = pneg %p1226_p8 }
  0x3a   : > { %p1234_p10 = pnand %p1233_p7, %p1227_p0 }
  0x3c   : > { %1237 = shalt.err (!%p1234_p10)
}
  0x3d   : > { %1111 = dma.hbm_to_vmem [thread:$0]  (!%p1481_p11), %s1748_s2, 64, %s1485_s21, [#allocation3]  }
  0x3e   : > { %s1238_s29 = scalar_lea.hbm %s1752_s6, 256 }
  0x3f   : > { %p1239_p9 = scmp.ne.s32.totalorder %s1752_s6, %s1238_s29  ;;  %p1245_p1 = scmp.lt.u32.totalorder %s1238_s29, %s1752_s6 }
  0x41   : > { %p1241_p12 = pnand %p1239_p9, %p1497_p13 }
  0x43   : > { %p1242_p2 = pneg %p1241_p12 }
  0x45   : > { %p1247_p4 = pnand %p1245_p1, %p1242_p2 }
  0x47   : > { %1250 = shalt.err (!%p1247_p4)
}
  0x48   : > { %s1251_s21 = scalar_lea.vmem %s1487_s24, 256  ;;  %p1259_p3 = scmp.lt.s32.totalorder %s1487_s24, %s1487_s24 }
  0x49   : > { %p1252_p6 = scmp.ne.s32.totalorder %s1487_s24, %s1251_s21  ;;  %p1260_p5 = scmp.lt.s32.totalorder %s1251_s21, %s1251_s21 }
  0x4b   : > { %p1254_p8 = pnand %p1252_p6, %p1497_p13  ;;  %p1261_p7 = por %p1260_p5, %p1259_p3 }
  0x4d   : > { %p1255_p0 = pneg %p1254_p8 }
  0x4f   : > { %p1262_p10 = pnand %p1261_p7, %p1255_p0 }
  0x51   : > { %1265 = shalt.err (!%p1262_p10)
}
  0x52   : > { %s1375_s19 = smov 64   ;;  %s1376_s14 = smov 4  }
  0x53   : > { %1117 = dma.hbm_to_vmem [thread:$0]  (!%p1481_p11), %s1752_s6, 256, %s1487_s24, [#allocation6], %s1375_s19, %s1375_s19, %s1376_s14  }
  0x54   : > { %s1560_s28 = sadd.s32 1, %s1370_s12   ;;  %s196_s29 = sadd.s32 1, %s1366_s11 }
  0x55   : > { %s193_s27 = ssub.s32 %s1370_s12, %s1560_s28  ;;  %p203_p9 = scmp.ne.s32.totalorder %s1366_s11, %s1362_s10 }
  0x56   : > { %p194_p13 = scmp.eq.s32.totalorder %s193_s27, 0  ;;  %p204_p12 = scmp.eq.s32.totalorder %s1370_s12, 0 }
  0x57   : > { %p1129_p2 = scmp.lt.s32.totalorder %s1370_s12, 2  ;;  %p1766_p4 = scmp.eq.s32.totalorder %s1453_s13, 1 }
  0x58   : > { %s1570_s18 = scalar_select %p194_p13, %s1366_s11, %s196_s29  }
  0x59   : > { %p205_p1 = por %p204_p12, %p203_p9  ;;  %p1574_p6 = por %p1766_p4, %p203_p9 }
  0x5a   : > { %s343_s22 = sand.u32 1, %s1366_s11   ;;  %s995_s23 = sshll.u32 %s1370_s12, 4 }
  0x5b   : > { %s1583_s21 = scalar_lea.hbm %s1753_s7, %s995_s23  ;;  %s346_s19 = scalar_lea.vmem [#allocation8], %s343_s22 }
  0x5c   : > { %s353_s14 = sshll.u32 %s346_s19, 4  ;;  %p1587_p11 = pnand %p1129_p2, %p205_p1  ;;  %s1585_s14 = int_to_ptr.vmem [resolvable:$true] %s353_s14 }
  0x5d   : > { %s344_s26 = scalar_lea.sflag [#allocation9], %s343_s22  ;;  %s1266_s27 = scalar_lea.hbm %s1583_s21, 16 }
  0x5e   : > { %p1267_p8 = scmp.ne.s32.totalorder %s1583_s21, %s1266_s27  ;;  %p1268_p0 = pneg %p1587_p11 }
  0x5f   : > { %s1271_s24 = scalar_lea.hbm %s1753_s7, 32  ;;  %p1272_p7 = scmp.lt.u32.totalorder %s1583_s21, %s1753_s7 }
  0x60   : > { %p1269_p3 = pnand %p1268_p0, %p1267_p8  ;;  %p1273_p10 = scmp.lt.u32.totalorder %s1271_s24, %s1266_s27 }
  0x61   : > { %p1275_p9 = scmp.lt.u32.totalorder %s1266_s27, %s1583_s21 }
  0x62   : > { %p1270_p5 = pneg %p1269_p3  ;;  %p1274_p13 = por %p1273_p10, %p1272_p7 }
  0x64   : > { %p1276_p12 = por %p1275_p9, %p1274_p13 }
  0x66   : > { %p1277_p2 = pnand %p1276_p12, %p1270_p5 }
  0x68   : > { %1280 = shalt.err (!%p1277_p2)
}
  0x69   : > { %s1281_s22 = scalar_lea.vmem %s1585_s14, 16  ;;  %s1377_s29 = smov [#allocation8]  }
  0x6a   : > { %p1282_p1 = scmp.ne.s32.totalorder %s1585_s14, %s1281_s22  ;;  %s1286_s23 = sshll.u32 %s1377_s29, 4  ;;  %s1287_s23 = int_to_ptr.vmem [resolvable:$false] %s1286_s23 }
  0x6b   : > { %s1288_s25 = scalar_lea.vmem %s1287_s23, 32  ;;  %p1289_p3 = scmp.lt.s32.totalorder %s1585_s14, %s1287_s23 }
  0x6c   : > { %p1284_p4 = pnand %p1282_p1, %p1268_p0  ;;  %p1290_p7 = scmp.lt.s32.totalorder %s1288_s25, %s1281_s22 }
  0x6e   : > { %p1285_p8 = pneg %p1284_p4  ;;  %p1291_p10 = por %p1290_p7, %p1289_p3 }
  0x70   : > { %p1292_p13 = pnand %p1291_p10, %p1285_p8 }
  0x72   : > { %1295 = shalt.err (!%p1292_p13)
}
  0x73   : > { %1121 = dma.hbm_to_vmem [thread:$0]  (!%p1587_p11), %s1583_s21, 16, %s1585_s14, %s344_s26  }
  0x74   : > { %p1769_p5 = scmp.ne.s32.totalorder %s1763_s17, 0 }
  0x75   : > { %p1770_p0 = scmp.eq.s32.totalorder (!%p1769_p5), %s1453_s13, 0 }
  0x76   : > { %362 = sbr.rel (%p1769_p5) target bundleno = 1683 (0x693), region = 56 }
  0x7d   : > { %1341 = dma.done.wait (%p1770_p0), [#allocation3], 64   ;;  %p1771_p9 = pmov %p1770_p0 }
  0x7e   : > { %p1772_p12 = pmov %p1770_p0 }
  0x7f   : > { %1343 = vsyncadd (%p1771_p9), [#allocation3], 4294967232 }
  0x80   : > { %1345 = dma.done.wait (%p1772_p12), [#allocation6], 272   ;;  %p1773_p2 = pmov %p1770_p0 }
  0x81   : > { %s1627_s16 = sand.u32 1, %s1362_s10   ;;  %p1774_p11 = scmp.ne.s32.totalorder %s1760_s15, 0 }
  0x82   : > { %1347 = vsyncadd (%p1773_p2), [#allocation6], 4294967024  ;;  %s377_s17 = scalar_lea.sflag [#allocation9], %s1627_s16  ;;  %s379_s21 = scalar_lea.vmem [#allocation8], %s1627_s16 }
  0x83   : > { %1349 = dma.done.wait (%p1774_p11), %s377_s17, 16  }
  0x84   : > { %1351 = vsyncadd (%p1774_p11), %s377_s17, 4294967280  ;;  %p425_p1 = scmp.lt.s32.totalorder %s1453_s13, 1  ;;  %v1378_v0 = vmov 0.0   ;;  %vm1379_vm0 = vmmov 0   ;;  %vm461_vm1 = vcmask 1043456   ;;  %vm457_vm2 = vcmask 64512  }
  0x85   : > { %1044 = vmatprep.subr.bf16.mxu0 %v1378_v0  ;;  %1046 = vmatprep.mubr.msk.bf16.mxu0 %vm1379_vm0, %v1378_v0  ;;  %v444_v1 = vld [vmem:[#allocation2] sm:$0xf]  ;;  %v1176_v5 = vld [vmem:[%s1750_s4 + $0x8] sm:$0xff]   ;;  %v1004_v6 = vld [vmem:[#allocation5] ss:$0 sm:$0xff]  ;;  %vm524_vm3 = vcmask 261120  }
  0x86   : > { %s1640_s14 = scalar_select %p425_p1, %s1453_s13, 1  ;;  %1050 = vmatprep.subr.bf16.mxu1 %v1378_v0  ;;  %1054 = vmatprep.mubr.msk.bf16.mxu1 %vm1379_vm0, %v1378_v0  ;;  %v463_v2 = vsel %vm461_vm1, %v444_v1, 0  ;;  %v1175_v4 = vld [vmem:[%s1750_s4] sm:$0xff]   ;;  %vm581_vm4 = vcmask 130048   ;;  %v1179_v21 = vld [vmem:[#allocation7 + $0x8] sm:$0xff]  }
  0x87   : > { %1045 = vmatpush3.bf16.msra.mxu0 %v463_v2  ;;  %1051 = vmatpush3.bf16.msra.mxu1 %v1175_v4  ;;  %v1178_v20 = vld [vmem:[#allocation7] sm:$0xff]   ;;  %v1016_v40 = vld [vmem:[%s379_s21] ss:$0 sm:$0xff]  ;;  %v1380_v52 = vmov 1065369472   ;;  %s424_s21 = scalar_lea.vmem [#allocation10], %s1627_s16 }
  0x88   : > { %s1025_s15 = sshll.u32 %s1640_s14, 3  ;;  %1058 = vmatprep.subr.bf16.mxu0 %v1378_v0  ;;  %1052 = vmatprep.subr.bf16.mxu1 %v1378_v0  ;;  %v1180_v39 = vld [vmem:[%s1754_s8] sm:$0xff]   ;;  %v1181_v53 = vld [vmem:[%s1754_s8 + $0x8] sm:$0xff]   ;;  %s862_s23 = sshll.u32 %s424_s21, 4  ;;  %s1699_s23 = int_to_ptr.vmem [resolvable:$true] %s862_s23 }
  0x89   : > { %s434_s24 = scalar_lea.vmem %s1747_s1, %s1025_s15  ;;  %s1652_s29 = scalar_lea.vmem %s1746_s0, %s1025_s15 }
  0x8a   : > { %v1174_v3 = vld [vmem:[%s434_s24] sm:$0xff]   ;;  %s437_s24 = scalar_lea.vmem %s1751_s5, %s1640_s14  ;;  %s1022_s25 = sshll.u32 %s1453_s13, 4 }
  0x8b   : > { %1047 = vmatmul.mubr.msk.bf16.vlgmr.msra.gmra.mrb[0].mxu0 %vm457_vm2, %v1174_v3  ;;  %1053 = vmatpush3.bf16.msra.mxu1 %v1176_v5  ;;  %v1177_v19 = vld [vmem:[%s1652_s29] sm:$0xff]   ;;  %s1704_s26 = scalar_lea.hbm %s1755_s9, %s1022_s25  ;;  %s850_s27 = scalar_lea.sflag [#allocation4], %s1627_s16 }
  0x8c   : > { %1060 = vmatprep.mubr.msk.bf16.mxu0 %vm1379_vm0, %v1378_v0  ;;  %1064 = vmatprep.subr.bf16.mxu1 %v1378_v0  ;;  %v1010_v22 = vld [vmem:[%s437_s24] ss:$0 sm:$0xff]  ;;  %s1296_s24 = scalar_lea.vmem %s1699_s23, 16  ;;  %s1381_s13 = smov [#allocation10]  }
  0x8d   : > { %p1297_p4 = scmp.ne.s32.totalorder %s1699_s23, %s1296_s24  ;;  %s1300_s14 = sshll.u32 %s1381_s13, 4  ;;  %s1301_s14 = int_to_ptr.vmem [resolvable:$false] %s1300_s14 }
  0x8e   : > { %s1302_s19 = scalar_lea.vmem %s1301_s14, 32  ;;  %p1303_p7 = scmp.lt.s32.totalorder %s1699_s23, %s1301_s14 }
  0x8f   : > { %p1298_p8 = pnand %p1297_p4, %p1574_p6  ;;  %p1304_p10 = scmp.lt.s32.totalorder %s1302_s19, %s1296_s24 }
  0x91   : > { %p1299_p3 = pneg %p1298_p8  ;;  %p1305_p13 = por %p1304_p10, %p1303_p7 }
  0x93   : > { %p1306_p5 = pnand %p1305_p13, %p1299_p3 }
 0x15e   : > { %v499_v7 = vpop.f32.mrb[0].mxu0 }
 0x15f   : > { %v1048_v8 = vpop.f32.mrb[1].mxu0  ;;  %v500_v10 = vadd.f32 %v1004_v6, %v499_v7 }
 0x160   : > { %v502_v9 = vpop.f32.mrb[2].mxu0 }
 0x161   : > { %v503_v11 = vadd.f32 %v1004_v6, %v502_v9  ;;  %v1049_v12 = vpop.f32.mrb[3].mxu0 }
 0x163   : > { %v511_v13 = vpack.c.bf16 %v503_v11, %v500_v10 }
 0x165   : > { %1055 = vmatmul.mubr.msk.bf16.vlgmr.msra.gmra.mrb[0].mxu1 %vm524_vm3, %v511_v13 }
 0x166   : > { %1068 = vmatprep.mubr.msk.bf16.mxu1 %vm1379_vm0, %v1378_v0  ;;  %1065 = vmatpush3.bf16.msra.mxu1 %v1178_v20 }
 0x167   : > { %1066 = vmatprep.subr.bf16.mxu1 %v1378_v0 }
 0x16a   : > { %1067 = vmatpush3.bf16.msra.mxu1 %v1179_v21 }
 0x16b   : > { %1078 = vmatprep.subr.bf16.mxu1 %v1378_v0 }
 0x238   : > { %v562_v14 = vpop.f32.mrb[0].mxu1 }
 0x239   : > { %v1056_v15 = vpop.f32.mrb[1].mxu1 }
 0x23a   : > { %v565_v16 = vpop.f32.mrb[2].mxu1 }
 0x23b   : > { %v569_v17 = vpack.c.bf16 %v565_v16, %v562_v14  ;;  %v1057_v18 = vpop.f32.mrb[3].mxu1 }
 0x23d   : > { %1059 = vmatpush3.bf16.msra.mxu0 %v569_v17 }
 0x23e   : > { %1072 = vmatprep.subr.bf16.mxu0 %v1378_v0 }
 0x240   : > { %1061 = vmatmul.mubr.msk.bf16.vlgmr.msra.gmra.mrb[4].mxu0 %vm581_vm4, %v1177_v19 }
 0x241   : > { %1074 = vmatprep.mubr.msk.bf16.mxu0 %vm1379_vm0, %v1378_v0 }
 0x313   : > { %v619_v23 = vpop.f32.mrb[4].mxu0 }
 0x314   : > { %v620_v24 = vadd.f32 %v1010_v22, %v619_v23  ;;  %v1062_v25 = vpop.f32.mrb[5].mxu0 }
 0x315   : > { %v622_v26 = vpop.f32.mrb[6].mxu0 }
 0x316   : > { %v626_v27 = vmax.f32 %v620_v24, 0.0  ;;  %v623_v28 = vadd.f32 %v1010_v22, %v622_v26  ;;  %v1063_v29 = vpop.f32.mrb[7].mxu0 }
 0x318   : > { %v627_v30 = vmax.f32 %v623_v28, 0.0  ;;  %v628_v31 = vadd.f32 %v626_v27, %v500_v10 }
 0x31a   : > { %v629_v32 = vadd.f32 %v627_v30, %v503_v11 }
 0x31c   : > { %v635_v33 = vpack.c.bf16 %v629_v32, %v628_v31 }
 0x31e   : > { %1069 = vmatmul.mubr.msk.bf16.vlgmr.msra.gmra.mrb[4].mxu1 %vm524_vm3, %v635_v33 }
 0x31f   : > { %1080 = vmatprep.mubr.msk.bf16.mxu1 %vm1379_vm0, %v1378_v0 }
 0x3f1   : > { %v685_v34 = vpop.f32.mrb[4].mxu1 }
 0x3f2   : > { %v1070_v35 = vpop.f32.mrb[5].mxu1 }
 0x3f3   : > { %v688_v36 = vpop.f32.mrb[6].mxu1 }
 0x3f4   : > { %v692_v37 = vpack.c.bf16 %v688_v36, %v685_v34  ;;  %v1071_v38 = vpop.f32.mrb[7].mxu1 }
 0x3f6   : > { %1073 = vmatpush3.bf16.msra.mxu0 %v692_v37 }
 0x3f7   : > { %1084 = vmatprep.subr.bf16.mxu0 %v1378_v0 }
 0x3f9   : > { %1075 = vmatmul.mubr.msk.bf16.vlgmr.msra.gmra.mrb[8].mxu0 %vm581_vm4, %v1177_v19 }
 0x3fa   : > { %1088 = vmatprep.mubr.msk.bf16.mxu0 %vm1379_vm0, %v1378_v0  ;;  %1085 = vmatpush3.bf16.msra.mxu0 %v1180_v39 }
 0x3fb   : > { %1086 = vmatprep.subr.bf16.mxu0 %v1378_v0 }
 0x3fe   : > { %1087 = vmatpush3.bf16.msra.mxu0 %v1181_v53 }
 0x4cc   : > { %v733_v41 = vpop.f32.mrb[8].mxu0 }
 0x4cd   : > { %v734_v42 = vadd.f32 %v1016_v40, %v733_v41  ;;  %v1076_v43 = vpop.f32.mrb[9].mxu0 }
 0x4ce   : > { %v736_v44 = vpop.f32.mrb[10].mxu0 }
 0x4cf   : > { %v740_v45 = vmax.f32 %v734_v42, 0.0  ;;  %v737_v46 = vadd.f32 %v1016_v40, %v736_v44  ;;  %v1077_v47 = vpop.f32.mrb[11].mxu0 }
 0x4d1   : > { %v741_v48 = vmax.f32 %v737_v46, 0.0  ;;  %v742_v49 = vadd.f32 %v740_v45, %v628_v31 }
 0x4d3   : > { %v743_v50 = vadd.f32 %v741_v48, %v629_v32 }
 0x4d5   : > { %v744_v51 = vpack.c.bf16 %v743_v50, %v742_v49 }
 0x4d7   : > { %1079 = vmatpush3.bf16.msra.mxu1 %v744_v51 }
 0x4da   : > { %1081 = vmatmul.mubr.msk.bf16.vlgmr.msra.gmra.mrb[8].mxu1 %vm581_vm4, %v1380_v52 }
 0x5ad   : > { %v782_v54 = vpop.f32.mrb[8].mxu1 }
 0x5ae   : > { %v788_v55 = vpack.c.bf16 %v782_v54, %v782_v54  ;;  %v1082_v56 = vpop.f32.mrb[9].mxu1 }
 0x5af   : > { %v785_v57 = vpop.f32.mrb[10].mxu1 }
 0x5b0   : > { %v1083_v58 = vpop.f32.mrb[11].mxu1  ;;  %1089 = vmatmul.mubr.msk.bf16.vlgmr.msra.gmra.mrb[12].mxu0 %vm524_vm3, %v788_v55 }
 0x683   : > { %v842_v59 = vpop.f32.mrb[12].mxu0 }
 0x684   : > { %848 = vst [vmem:[%s424_s21] sm:$0x1] %v842_v59  ;;  %v1090_v60 = vpop.f32.mrb[13].mxu0 }
 0x685   : > { %v845_v61 = vpop.f32.mrb[14].mxu0 }
 0x686   : > { %1309 = shalt.err (!%p1306_p5)
}
 0x687   : > { %s1310_s16 = scalar_lea.hbm %s1704_s26, 16  ;;  %s1314_s21 = scalar_lea.hbm %s1755_s9, 32 }
 0x688   : > { %p1311_p0 = scmp.ne.s32.totalorder %s1704_s26, %s1310_s16  ;;  %p1315_p2 = scmp.lt.u32.totalorder %s1704_s26, %s1755_s9 }
 0x689   : > { %p1316_p11 = scmp.lt.u32.totalorder %s1314_s21, %s1310_s16  ;;  %p1318_p4 = scmp.lt.u32.totalorder %s1310_s16, %s1704_s26 }
 0x68a   : > { %p1312_p9 = pnand %p1311_p0, %p1574_p6 }
 0x68b   : > { %p1317_p1 = por %p1316_p11, %p1315_p2 }
 0x68c   : > { %p1313_p12 = pneg %p1312_p9 }
 0x68d   : > { %p1319_p8 = por %p1318_p4, %p1317_p1 }
 0x68f   : > { %p1320_p3 = pnand %p1319_p8, %p1313_p12 }
 0x691   : > { %1323 = shalt.err (!%p1320_p3)
}
 0x692   : > { %1106 = dma.vmem_to_hbm [thread:$0]  (%p1574_p6), %s1699_s23, 16, %s1704_s26, %s850_s27   ;;  %v1091_v62 = vpop.f32.mrb[15].mxu0 }
 0x693 PF: > { %s1775_s15 = sld [smem:[#allocation15_spill]]  ;;  %s874_s24 = sand.u32 1, %s1358_s30  }
 0x694   : > { %p1777_p10 = scmp.ge.s32.totalorder %s1370_s12, 2  ;;  %s875_s13 = scalar_lea.sflag [#allocation4], %s874_s24 }
 0x699   : > { %p1776_p7 = scmp.ne.s32.totalorder %s1775_s15, 0 }
 0x69b   : > { %p1123_p13 = pnand %p1777_p10, %p1776_p7 }
 0x69d   : > { %1353 = dma.done.wait (!%p1123_p13), %s875_s13, 16  }
 0x69e   : > { %1355 = vsyncadd (!%p1123_p13), %s875_s13, 4294967280  ;;  %p24_p5 = scmp.ge.s32.totalorder %s1560_s28, 4   ;;  %s1778_s30 = smov %s1362_s10 }
 0x69f   : > { %s1779_s10 = smov %s1366_s11  ;;  %s1780_s11 = smov %s1570_s18 }
 0x6a0   : > { %s1781_s12 = smov %s1560_s28  ;;  %26 = sbr.rel (!%p24_p5) target bundleno = 7 (0x7), region = 123 }
 0x6a7   :  { %879 = vsyncpa [#allocation3], 1 }
 0x6a8   :  { %881 = vsyncpa [#allocation3 + $0x1], 1 }
 0x6a9   :  { %882 = vsyncpa [#allocation6], 1 }
 0x6aa   :  { %883 = vsyncpa [#allocation9], 1 }
 0x6ab   :  { %885 = vsyncpa [#allocation9 + $0x1], 1 }
 0x6ac   :  { %886 = vsyncpa [#allocation4], 1 }
 0x6ad   :  { %888 = vsyncpa [#allocation4 + $0x1], 1 }

</bundles_post_ra>
